<compile_context>
chip_gen: v7x
topology: tpu7x:2x2x1
jax: 0.10.0
libtpu: 0.0.40
codegen_flags: <defaults>
</compile_context>

<pallas_src>
import functools

import jax
import jax.numpy as jnp
from jax.experimental import pallas as pl
from jax.experimental.pallas import tpu as pltpu


QDIM = 4          # generalized-coordinate dimension
HIDDEN = 32       # hidden_sizes = [32, 32]
LN_EPS = 1e-5     # torch.nn.LayerNorm default eps


def _round_up(x, m):
    return ((x + m - 1) // m) * m


def _potential_kernel(q_ref, w1_ref, b1_ref, g_ref, beta_ref,
                      w23_ref, b23_ref, o_ref):
    """Fused MLP: Linear -> LayerNorm -> tanh -> (Linear∘Linear).

    q_ref  : (TM, QDIM)   tile of generalized coordinates
    w23_ref: (1, H)       fused (W2 @ W3)^T row
    o_ref  : (1, 1, TM)   lane-dense tile of potential values
    """
    q = q_ref[...].astype(jnp.float32)

    # --- hidden layer: Linear(qdim -> H) ----------------------------------
    h = jnp.dot(q, w1_ref[...], preferred_element_type=jnp.float32) + b1_ref[...]

    # --- LayerNorm over the feature (lane) axis ----------------------------
    mu = jnp.mean(h, axis=-1, keepdims=True)
    var = jnp.mean((h - mu) * (h - mu), axis=-1, keepdims=True)
    h = (h - mu) * jax.lax.rsqrt(var + LN_EPS)
    h = h * g_ref[...] + beta_ref[...]

    # --- tanh activation (EUP) ---------------------------------------------
    h = jnp.tanh(h)

    # --- fused Linear(H->H) ∘ Linear(H->1) ---------------------------------
    # NT-form contraction so the result is a lane-dense (1, TM) row instead of
    # a (TM, 1) column (avoids 1-of-128-lane masked stores on the output).
    y = jnp.einsum("ok,nk->on", w23_ref[...], h,
                   preferred_element_type=jnp.float32)          # (1, TM)
    y = y + b23_ref[...]                                        # b23: (1, 1)

    o_ref[...] = y[None].astype(o_ref.dtype)                    # (1, 1, TM)


@functools.partial(jax.jit, static_argnames=("max_tile",))
def potential_net(q, params, *, max_tile=1024):
    """q: [N, QDIM] float32.  Returns potential values [N, 1]."""
    w1, b1, g1, be1, w2, b2, w3, b3 = params
    qdim = q.shape[-1]
    hdim = w1.shape[1]

    # Algebraic fusion of the two trailing Linears (no nonlinearity between):
    #   y = (t @ W2 + b2) @ W3 + b3 = t @ (W2 @ W3) + (b2 @ W3 + b3)
    # Done once in the wrapper; exact up to f32 rounding.
    w23 = (w2 @ w3).T                    # (1, H) row for the NT contraction
    b23 = b2 @ w3 + b3                   # (1, 1)

    # Tile/pad the batch: big tiles amortize per-grid-step overhead, a
    # 128-multiple tile keeps the output store lane-dense; pad rows are
    # computed on zeros and sliced off afterwards (no divisibility assert).
    n = q.shape[0]
    tile = min(max_tile, _round_up(n, 128))
    n_pad = _round_up(n, tile)
    if n_pad != n:
        q = jnp.pad(q, ((0, n_pad - n), (0, 0)))
    grid_n = n_pad // tile

    full = lambda i: (0, 0)              # weights/biases: same block every step
    out = pl.pallas_call(
        _potential_kernel,
        out_shape=jax.ShapeDtypeStruct((grid_n, 1, tile), jnp.float32),
        grid_spec=pltpu.PrefetchScalarGridSpec(
            num_scalar_prefetch=0,
            grid=(grid_n,),
            in_specs=[
                pl.BlockSpec((tile, qdim), lambda i: (i, 0)),   # q row tile
                pl.BlockSpec((qdim, hdim), full),               # W1 [in, out]
                pl.BlockSpec((1, hdim), full),                  # b1
                pl.BlockSpec((1, hdim), full),                  # LayerNorm gamma
                pl.BlockSpec((1, hdim), full),                  # LayerNorm beta
                pl.BlockSpec((1, hdim), full),                  # fused W23 row
                pl.BlockSpec((1, 1), full),                     # fused b23
            ],
            out_specs=pl.BlockSpec((1, 1, tile), lambda i: (i, 0, 0)),
        ),
        compiler_params=pltpu.CompilerParams(
            dimension_semantics=("parallel",),      # shard grid across v7x TCs
            vmem_limit_bytes=32 * 1024 * 1024,      # ample headroom, <=64 MiB v7x
        ),
    )(q, w1, b1, g1, be1, w23, b23)

    # (grid, 1, tile) lane-dense slab -> [N, 1]; pure layout plumbing in XLA.
    return out.reshape(n_pad, 1)[:n]


def init_params(key, qdim=QDIM, hidden=HIDDEN):
    """Deterministic synthetic params.  Linear weights stored as [in, out]."""
    ks = jax.random.split(key, 6)

    def lin(kw, kb, fan_in, fan_out):
        bound = 1.0 / jnp.sqrt(fan_in)
        w = jax.random.uniform(kw, (fan_in, fan_out), jnp.float32, -bound, bound)
        b = jax.random.uniform(kb, (1, fan_out), jnp.float32, -bound, bound)
        return w, b

    w1, b1 = lin(ks[0], ks[1], qdim, hidden)     # LNMLP hidden Linear
    w2, b2 = lin(ks[2], ks[3], hidden, hidden)   # LNMLP output Linear
    w3, b3 = lin(ks[4], ks[5], hidden, 1)        # PotentialNet.out Linear
    g1 = jnp.ones((1, hidden), jnp.float32)      # LayerNorm weight
    be1 = jnp.zeros((1, hidden), jnp.float32)    # LayerNorm bias
    return (w1, b1, g1, be1, w2, b2, w3, b3)


def reference(q, params):
    """Pure-JAX reference of the same (unfused) forward pass."""
    w1, b1, g1, be1, w2, b2, w3, b3 = params
    h = q @ w1 + b1
    mu = jnp.mean(h, axis=-1, keepdims=True)
    var = jnp.mean((h - mu) ** 2, axis=-1, keepdims=True)
    h = (h - mu) / jnp.sqrt(var + LN_EPS) * g1 + be1
    h = jnp.tanh(h)
    e = h @ w2 + b2
    return e @ w3 + b3


if __name__ == "__main__":
    key = jax.random.PRNGKey(0)
    kq, kp = jax.random.split(key)

    N = 64  # batch of q samples
    q = jax.random.normal(kq, (N, QDIM), jnp.float32)
    params = init_params(kp)

    out = potential_net(q, params)
    out = jax.block_until_ready(out)

    ref = reference(q, params)
    assert out.shape == (N, 1)
    assert jnp.allclose(out, ref, atol=1e-5, rtol=1e-5), "mismatch vs reference"

    print("KERNEL_OK")
</pallas_src>

<mosaic_0001>
module attributes {stable_mosaic.version = 11 : i64} {
  func.func @_potential_kernel(%arg0: i32, %arg1: memref<128x4xf32, #tpu.memory_space<vmem>>, %arg2: memref<4x32xf32, #tpu.memory_space<vmem>>, %arg3: memref<1x32xf32, #tpu.memory_space<vmem>>, %arg4: memref<1x32xf32, #tpu.memory_space<vmem>>, %arg5: memref<1x32xf32, #tpu.memory_space<vmem>>, %arg6: memref<1x32xf32, #tpu.memory_space<vmem>>, %arg7: memref<1x1xf32, #tpu.memory_space<vmem>>, %arg8: memref<1x1x128xf32, #tpu.memory_space<vmem>>) attributes {dimension_semantics = [#tpu.dimension_semantics<parallel>], iteration_bounds = array<i64: 1>, scalar_prefetch = 0 : i64, scratch_operands = 0 : i64, tpu.core_type = #tpu.core_type<tc>, window_params = [{transform_indices = @transform_0, window_bounds = array<i64: 128, 4>}, {pipeline_mode = #tpu.pipeline_mode<synchronous>, transform_indices = @transform_1, window_bounds = array<i64: 4, 32>}, {pipeline_mode = #tpu.pipeline_mode<synchronous>, transform_indices = @transform_2, window_bounds = array<i64: 1, 32>}, {pipeline_mode = #tpu.pipeline_mode<synchronous>, transform_indices = @transform_3, window_bounds = array<i64: 1, 32>}, {pipeline_mode = #tpu.pipeline_mode<synchronous>, transform_indices = @transform_4, window_bounds = array<i64: 1, 32>}, {pipeline_mode = #tpu.pipeline_mode<synchronous>, transform_indices = @transform_5, window_bounds = array<i64: 1, 32>}, {pipeline_mode = #tpu.pipeline_mode<synchronous>, transform_indices = @transform_6, window_bounds = array<i64: 1, 1>}, {transform_indices = @transform_7, window_bounds = array<i64: 1, 1, 128>}]} {
    %c0 = arith.constant 0 : index
    %c0_0 = arith.constant 0 : index
    %0 = vector.load %arg1[%c0, %c0_0] : memref<128x4xf32, #tpu.memory_space<vmem>>, vector<128x4xf32>
    %c0_1 = arith.constant 0 : index
    %c0_2 = arith.constant 0 : index
    %1 = vector.load %arg2[%c0_1, %c0_2] : memref<4x32xf32, #tpu.memory_space<vmem>>, vector<4x32xf32>
    %cst = arith.constant dense<0.000000e+00> : vector<128x32xf32>
    %2 = tpu.matmul %0, %1, %cst {dimension_numbers = #tpu.dot_dimension_numbers<[1], [0], [0], [1], [0, 0, 1, 1], [], []>} : vector<128x4xf32>, vector<4x32xf32>, vector<128x32xf32> -> vector<128x32xf32>
    %c0_3 = arith.constant 0 : index
    %c0_4 = arith.constant 0 : index
    %3 = vector.load %arg3[%c0_3, %c0_4] : memref<1x32xf32, #tpu.memory_space<vmem>>, vector<1x32xf32>
    %4 = vector.broadcast %3 : vector<1x32xf32> to vector<128x32xf32>
    %5 = arith.addf %2, %4 : vector<128x32xf32>
    %cst_5 = arith.constant dense<0.000000e+00> : vector<128xf32>
    %6 = vector.multi_reduction <add>, %5, %cst_5 [1] : vector<128x32xf32> to vector<128xf32>
    %7 = vector.shape_cast %6 : vector<128xf32> to vector<128x1xf32>
    %cst_6 = arith.constant 3.200000e+01 : f32
    %8 = vector.broadcast %cst_6 : f32 to vector<128x1xf32>
    %9 = arith.divf %7, %8 : vector<128x1xf32>
    %10 = vector.broadcast %9 : vector<128x1xf32> to vector<128x32xf32>
    %11 = arith.subf %5, %10 : vector<128x32xf32>
    %12 = vector.broadcast %9 : vector<128x1xf32> to vector<128x32xf32>
    %13 = arith.subf %5, %12 : vector<128x32xf32>
    %14 = arith.mulf %11, %13 : vector<128x32xf32>
    %cst_7 = arith.constant dense<0.000000e+00> : vector<128xf32>
    %15 = vector.multi_reduction <add>, %14, %cst_7 [1] : vector<128x32xf32> to vector<128xf32>
    %16 = vector.shape_cast %15 : vector<128xf32> to vector<128x1xf32>
    %cst_8 = arith.constant 3.200000e+01 : f32
    %17 = vector.broadcast %cst_8 : f32 to vector<128x1xf32>
    %18 = arith.divf %16, %17 : vector<128x1xf32>
    %19 = vector.broadcast %9 : vector<128x1xf32> to vector<128x32xf32>
    %20 = arith.subf %5, %19 : vector<128x32xf32>
    %cst_9 = arith.constant 9.99999974E-6 : f32
    %21 = vector.broadcast %cst_9 : f32 to vector<128x1xf32>
    %22 = arith.addf %18, %21 : vector<128x1xf32>
    %23 = math.rsqrt %22 : vector<128x1xf32>
    %24 = vector.broadcast %23 : vector<128x1xf32> to vector<128x32xf32>
    %25 = arith.mulf %20, %24 : vector<128x32xf32>
    %c0_10 = arith.constant 0 : index
    %c0_11 = arith.constant 0 : index
    %26 = vector.load %arg4[%c0_10, %c0_11] : memref<1x32xf32, #tpu.memory_space<vmem>>, vector<1x32xf32>
    %27 = vector.broadcast %26 : vector<1x32xf32> to vector<128x32xf32>
    %28 = arith.mulf %25, %27 : vector<128x32xf32>
    %c0_12 = arith.constant 0 : index
    %c0_13 = arith.constant 0 : index
    %29 = vector.load %arg5[%c0_12, %c0_13] : memref<1x32xf32, #tpu.memory_space<vmem>>, vector<1x32xf32>
    %30 = vector.broadcast %29 : vector<1x32xf32> to vector<128x32xf32>
    %31 = arith.addf %28, %30 : vector<128x32xf32>
    %32 = math.tanh %31 : vector<128x32xf32>
    %c0_14 = arith.constant 0 : index
    %c0_15 = arith.constant 0 : index
    %33 = vector.load %arg6[%c0_14, %c0_15] : memref<1x32xf32, #tpu.memory_space<vmem>>, vector<1x32xf32>
    "tpu.trace_start"() <{level = 10 : i32, message = "ok,nk->on"}> : () -> ()
    %cst_16 = arith.constant dense<0.000000e+00> : vector<1x128xf32>
    %34 = tpu.matmul %33, %32, %cst_16 {dimension_numbers = #tpu.dot_dimension_numbers<[1], [1], [0], [0], [0, 0, 1, 0], [], []>} : vector<1x32xf32>, vector<128x32xf32>, vector<1x128xf32> -> vector<1x128xf32>
    "tpu.trace_stop"() : () -> ()
    %c0_17 = arith.constant 0 : index
    %c0_18 = arith.constant 0 : index
    %35 = vector.load %arg7[%c0_17, %c0_18] : memref<1x1xf32, #tpu.memory_space<vmem>>, vector<1x1xf32>
    %36 = vector.broadcast %35 : vector<1x1xf32> to vector<1x128xf32>
    %37 = arith.addf %34, %36 : vector<1x128xf32>
    %38 = vector.shape_cast %37 : vector<1x128xf32> to vector<1x1x128xf32>
    %c0_19 = arith.constant 0 : index
    %c0_20 = arith.constant 0 : index
    %c0_21 = arith.constant 0 : index
    %39 = vector.load %arg8[%c0_19, %c0_20, %c0_21] : memref<1x1x128xf32, #tpu.memory_space<vmem>>, vector<1x1x128xf32>
    tpu.vector_store %arg8[%c0_19, %c0_20, %c0_21], %38 {strides = array<i32>} : memref<1x1x128xf32, #tpu.memory_space<vmem>>, vector<1x1x128xf32>,
    return
  }
  func.func @transform_0(%arg0: i32) -> (i32, i32) {
    %c0_i32 = arith.constant 0 : i32
    %c0_i32_0 = arith.constant 0 : i32
    return %arg0, %c0_i32 : i32, i32
  }
  func.func @transform_1(%arg0: i32) -> (i32, i32) {
    %c0_i32 = arith.constant 0 : i32
    %c0_i32_0 = arith.constant 0 : i32
    %c0_i32_1 = arith.constant 0 : i32
    return %c0_i32, %c0_i32_0 : i32, i32
  }
  func.func @transform_2(%arg0: i32) -> (i32, i32) {
    %c0_i32 = arith.constant 0 : i32
    %c0_i32_0 = arith.constant 0 : i32
    %c0_i32_1 = arith.constant 0 : i32
    return %c0_i32, %c0_i32_0 : i32, i32
  }
  func.func @transform_3(%arg0: i32) -> (i32, i32) {
    %c0_i32 = arith.constant 0 : i32
    %c0_i32_0 = arith.constant 0 : i32
    %c0_i32_1 = arith.constant 0 : i32
    return %c0_i32, %c0_i32_0 : i32, i32
  }
  func.func @transform_4(%arg0: i32) -> (i32, i32) {
    %c0_i32 = arith.constant 0 : i32
    %c0_i32_0 = arith.constant 0 : i32
    %c0_i32_1 = arith.constant 0 : i32
    return %c0_i32, %c0_i32_0 : i32, i32
  }
  func.func @transform_5(%arg0: i32) -> (i32, i32) {
    %c0_i32 = arith.constant 0 : i32
    %c0_i32_0 = arith.constant 0 : i32
    %c0_i32_1 = arith.constant 0 : i32
    return %c0_i32, %c0_i32_0 : i32, i32
  }
  func.func @transform_6(%arg0: i32) -> (i32, i32) {
    %c0_i32 = arith.constant 0 : i32
    %c0_i32_0 = arith.constant 0 : i32
    %c0_i32_1 = arith.constant 0 : i32
    return %c0_i32, %c0_i32_0 : i32, i32
  }
  func.func @transform_7(%arg0: i32) -> (i32, i32, i32) {
    %c0_i32 = arith.constant 0 : i32
    %c0_i32_0 = arith.constant 0 : i32
    %c0_i32_1 = arith.constant 0 : i32
    return %arg0, %c0_i32, %c0_i32_0 : i32, i32, i32
  }
}

</mosaic_0001>

<bundles_post_ra>
// kernel: potential_net.1
= control target key start
LH: loop header
LB: loop body
LE: loop exit
PB: predicated region body
PF: predicated region fallthrough
CT: control target
= control target key end

     0   :  { %vm101_vm0 = vcmask 1043456   ;;  %vm52_vm1 = vcmask 31744   ;;  %vm250_vm2 = vcmask 261120   ;;  %vm893_vm3 = vmmov 0   ;;  %s1264_s1 = inlined_call_operand.vmem [shape: f32[4,32], index: 1, kind: input, shape index: {}]   ;;  %s1265_s0 = inlined_call_operand.vmem [shape: f32[128,4], index: 0, kind: input, shape index: {}]   ;;  %s1266_s2 = inlined_call_operand.vmem [shape: f32[1,32], index: 2, kind: input, shape index: {}]   ;;  %s1267_s6 = inlined_call_operand.<no memory space> [shape: f32[1,1], index: 6, kind: input, shape index: {}]   ;;  %s1268_s3 = inlined_call_operand.vmem [shape: f32[1,32], index: 3, kind: input, shape index: {}]   ;;  %s1269_s4 = inlined_call_operand.vmem [shape: f32[1,32], index: 4, kind: input, shape index: {}]   ;;  %s1270_s5 = inlined_call_operand.vmem [shape: f32[1,32], index: 5, kind: input, shape index: {}]   ;;  %s1271_s7 = inlined_call_operand.vmem [shape: f32[1,1,128], index: 7, kind: output, shape index: {}]  }
   0x1   :  { %v44_v0 = vld [vmem:[%s1264_s1] sm:$0xf]  ;;  %v29_v2 = vld [vmem:[%s1265_s0 + $0x8] sm:$0xff]  ;;  %v30_v3 = vld [vmem:[%s1265_s0 + $0x10] sm:$0xff] }
   0x2   :  { %v28_v1 = vld [vmem:[%s1265_s0] sm:$0xff]  ;;  %730 = vmatprep.subr.msk.mxu0 %vm101_vm0, %v44_v0  ;;  %v31_v4 = vld [vmem:[%s1265_s0 + $0x18] sm:$0xff]  ;;  %v33_v6 = vld [vmem:[%s1265_s0 + $0x28] sm:$0xff] }
   0x3   :  { %732 = vmatprep.mubr.msk.f32.mxu0 %vm52_vm1, %v28_v1  ;;  %731 = vmatpush3.msk.msra.mxu0 %vm101_vm0, %v44_v0  ;;  %v32_v5 = vld [vmem:[%s1265_s0 + $0x20] sm:$0xff]  ;;  %v34_v7 = vld [vmem:[%s1265_s0 + $0x30] sm:$0xff]  ;;  %v35_v8 = vld [vmem:[%s1265_s0 + $0x38] sm:$0xff] }
   0x4   :  { %733 = vmatmul.mubr.msk.f32.vlgmr.msra.gmra.mrb[0].mxu0 %vm52_vm1, %v29_v2  ;;  %v36_v9 = vld [vmem:[%s1265_s0 + $0x40] sm:$0xff]  ;;  %v37_v10 = vld [vmem:[%s1265_s0 + $0x48] sm:$0xff]  ;;  %v38_v11 = vld [vmem:[%s1265_s0 + $0x50] sm:$0xff] }
   0x5   :  { %735 = vmatprep.mubr.msk.f32.mxu0 %vm52_vm1, %v30_v3  ;;  %v39_v12 = vld [vmem:[%s1265_s0 + $0x58] sm:$0xff]  ;;  %v40_v13 = vld [vmem:[%s1265_s0 + $0x60] sm:$0xff]  ;;  %v41_v14 = vld [vmem:[%s1265_s0 + $0x68] sm:$0xff] }
   0x6   :  { %v42_v15 = vld [vmem:[%s1265_s0 + $0x70] sm:$0xff]  ;;  %v43_v16 = vld [vmem:[%s1265_s0 + $0x78] sm:$0xff]  ;;  %v659_v17 = vld [vmem:[%s1266_s2] ss:$0 sm:$0xff] }
   0x7   :  { %vm1200_vm4 = vmpackc.low %vm250_vm2, %vm250_vm2 }
   0x8   :  { %736 = vmatmul.mubr.msk.f32.gmra.mrb[2].mxu0 %vm52_vm1, %v31_v4 }
   0x9   :  { %738 = vmatprep.mubr.msk.f32.mxu0 %vm52_vm1, %v32_v5 }
   0xc   :  { %739 = vmatmul.mubr.msk.f32.gmra.mrb[4].mxu0 %vm52_vm1, %v33_v6 }
   0xd   :  { %741 = vmatprep.mubr.msk.f32.mxu0 %vm52_vm1, %v34_v7 }
  0x10   :  { %742 = vmatmul.mubr.msk.f32.gmra.mrb[6].mxu0 %vm52_vm1, %v35_v8 }
  0x11   :  { %744 = vmatprep.mubr.msk.f32.mxu0 %vm52_vm1, %v36_v9 }
  0x14   :  { %745 = vmatmul.mubr.msk.f32.gmra.mrb[8].mxu0 %vm52_vm1, %v37_v10 }
  0x15   :  { %747 = vmatprep.mubr.msk.f32.mxu0 %vm52_vm1, %v38_v11 }
  0x18   :  { %748 = vmatmul.mubr.msk.f32.gmra.mrb[10].mxu0 %vm52_vm1, %v39_v12 }
  0x19   :  { %750 = vmatprep.mubr.msk.f32.mxu0 %vm52_vm1, %v40_v13 }
  0x1c   :  { %751 = vmatmul.mubr.msk.f32.gmra.mrb[12].mxu0 %vm52_vm1, %v41_v14 }
  0x1d   :  { %753 = vmatprep.mubr.msk.f32.mxu0 %vm52_vm1, %v42_v15 }
  0x20   :  { %754 = vmatmul.mubr.msk.f32.gmra.mrb[14].mxu0 %vm52_vm1, %v43_v16 }
  0xd7   :  { %v734_v18 = vpop.f32.mrb[0].mxu0 }
  0xd8   :  { %v171_v19 = vpop.f32.mrb[1].mxu0  ;;  %v1008_v21 = vadd.f32 %v734_v18, %v659_v17 }
  0xd9   :  { %v1006_v20 = vadd.f32 %v659_v17, %v171_v19 }
  0xda   :  { %v254_v29 = vsel %vm250_vm2, %v1008_v21, 0.0 }
  0xdb   :  { %v737_v22 = vpop.f32.mrb[2].mxu0  ;;  %v251_v23 = vsel %vm250_vm2, %v1006_v20, 0.0 }
  0xdc   :  { %v181_v24 = vpop.f32.mrb[3].mxu0  ;;  %252 = vadd.xlane.f32.xlu0 %v251_v23  ;;  %v1012_v25 = vadd.f32 %v737_v22, %v659_v17 }
  0xdd   :  { %v1014_v26 = vadd.f32 %v659_v17, %v181_v24 }
  0xde   :  { %v260_v33 = vsel %vm250_vm2, %v1012_v25, 0.0 }
  0xdf   :  { %v740_v27 = vpop.f32.mrb[4].mxu0  ;;  %v257_v28 = vsel %vm250_vm2, %v1014_v26, 0.0 }
  0xe0   :  { %v191_v30 = vpop.f32.mrb[5].mxu0  ;;  %258 = vadd.xlane.f32.xlu1 %v257_v28  ;;  %255 = vadd.xlane.f32.xlu0 %v254_v29  ;;  %v1020_v31 = vadd.f32 %v740_v27, %v659_v17 }
  0xe1   :  { %v1022_v32 = vadd.f32 %v659_v17, %v191_v30 }
  0xe2   :  { %v266_v39 = vsel %vm250_vm2, %v1020_v31, 0.0 }
  0xe3   :  { %v743_v34 = vpop.f32.mrb[6].mxu0  ;;  %v263_v35 = vsel %vm250_vm2, %v1022_v32, 0.0 }
  0xe4   :  { %v201_v36 = vpop.f32.mrb[7].mxu0  ;;  %261 = vadd.xlane.f32.xlu1 %v260_v33  ;;  %264 = vadd.xlane.f32.xlu0 %v263_v35  ;;  %v1028_v37 = vadd.f32 %v743_v34, %v659_v17 }
  0xe5   :  { %v1030_v38 = vadd.f32 %v659_v17, %v201_v36 }
  0xe6   :  { %v272_v45 = vsel %vm250_vm2, %v1028_v37, 0.0 }
  0xe7   :  { %v746_v40 = vpop.f32.mrb[8].mxu0  ;;  %v269_v41 = vsel %vm250_vm2, %v1030_v38, 0.0 }
  0xe8   :  { %v211_v42 = vpop.f32.mrb[9].mxu0  ;;  %267 = vadd.xlane.f32.xlu1 %v266_v39  ;;  %270 = vadd.xlane.f32.xlu0 %v269_v41  ;;  %v1036_v43 = vadd.f32 %v746_v40, %v659_v17 }
  0xe9   :  { %v1038_v44 = vadd.f32 %v659_v17, %v211_v42 }
  0xea   :  { %v278_v51 = vsel %vm250_vm2, %v1036_v43, 0.0 }
  0xeb   :  { %v749_v46 = vpop.f32.mrb[10].mxu0  ;;  %v275_v47 = vsel %vm250_vm2, %v1038_v44, 0.0 }
  0xec   :  { %v221_v48 = vpop.f32.mrb[11].mxu0  ;;  %273 = vadd.xlane.f32.xlu1 %v272_v45  ;;  %276 = vadd.xlane.f32.xlu0 %v275_v47  ;;  %v1044_v49 = vadd.f32 %v749_v46, %v659_v17 }
  0xed   :  { %v1046_v50 = vadd.f32 %v659_v17, %v221_v48 }
  0xee   :  { %v284_v57 = vsel %vm250_vm2, %v1044_v49, 0.0 }
  0xef   :  { %v752_v52 = vpop.f32.mrb[12].mxu0  ;;  %v281_v53 = vsel %vm250_vm2, %v1046_v50, 0.0 }
  0xf0   :  { %v231_v54 = vpop.f32.mrb[13].mxu0  ;;  %279 = vadd.xlane.f32.xlu1 %v278_v51  ;;  %282 = vadd.xlane.f32.xlu0 %v281_v53  ;;  %v1052_v55 = vadd.f32 %v752_v52, %v659_v17 }
  0xf1   :  { %v1054_v56 = vadd.f32 %v659_v17, %v231_v54 }
  0xf2   :  { %v290_v63 = vsel %vm250_vm2, %v1052_v55, 0.0 }
  0xf3   :  { %v755_v58 = vpop.f32.mrb[14].mxu0  ;;  %v287_v59 = vsel %vm250_vm2, %v1054_v56, 0.0 }
  0xf4   :  { %v241_v60 = vpop.f32.mrb[15].mxu0  ;;  %285 = vadd.xlane.f32.xlu1 %v284_v57  ;;  %288 = vadd.xlane.f32.xlu0 %v287_v59  ;;  %v1060_v61 = vadd.f32 %v755_v58, %v659_v17 }
  0xf5   :  { %v1062_v62 = vadd.f32 %v659_v17, %v241_v60 }
  0xf6   :  { %v296_v1 = vsel %vm250_vm2, %v1060_v61, 0.0 }
  0xf7   :  { %v293_v0 = vsel %vm250_vm2, %v1062_v62, 0.0 }
  0xf8   :  { %291 = vadd.xlane.f32.xlu1 %v290_v63  ;;  %294 = vadd.xlane.f32.xlu0 %v293_v0 }
  0xfc   :  { %297 = vadd.xlane.f32.xlu1 %v296_v1 }
 0x169   :  { %v253_v2 = vpop.xlane.xlu0 %252 }
 0x16a   :  { %v300_v3 = vmul.f32 0.03125, %v253_v2 }
 0x16c   :  { %v1071_v4 = vsub.f32 %v1006_v20, %v300_v3 }
 0x16d   :  { %v259_v5 = vpop.xlane.xlu1 %258  ;;  %v256_v6 = vpop.xlane.xlu0 %255 }
 0x16e   :  { %v302_v7 = vmul.f32 0.03125, %v259_v5  ;;  %v301_v8 = vmul.f32 0.03125, %v256_v6  ;;  %v332_v9 = vmul.f32 %v1071_v4, %v1071_v4 }
 0x170   :  { %v1076_v10 = vsub.f32 %v1014_v26, %v302_v7  ;;  %v1079_v11 = vsub.f32 %v1008_v21, %v301_v8  ;;  %v348_v12 = vsel %vm250_vm2, %v332_v9, 0.0 }
 0x171   :  { %v262_v13 = vpop.xlane.xlu1 %261  ;;  %349 = vadd.xlane.f32.xlu0 %v348_v12  ;;  %v265_v14 = vpop.xlane.xlu0 %264 }
 0x172   :  { %v303_v15 = vmul.f32 0.03125, %v262_v13  ;;  %v304_v16 = vmul.f32 0.03125, %v265_v14  ;;  %v334_v17 = vmul.f32 %v1076_v10, %v1076_v10  ;;  %v333_v18 = vmul.f32 %v1079_v11, %v1079_v11 }
 0x174   :  { %v1087_v19 = vsub.f32 %v1012_v25, %v303_v15  ;;  %v1090_v20 = vsub.f32 %v1022_v32, %v304_v16  ;;  %v354_v21 = vsel %vm250_vm2, %v334_v17, 0.0  ;;  %v351_v22 = vsel %vm250_vm2, %v333_v18, 0.0 }
 0x175   :  { %v268_v23 = vpop.xlane.xlu1 %267  ;;  %355 = vadd.xlane.f32.xlu0 %v354_v21  ;;  %352 = vadd.xlane.f32.xlu1 %v351_v22  ;;  %v271_v24 = vpop.xlane.xlu0 %270 }
 0x176   :  { %v305_v26 = vmul.f32 0.03125, %v268_v23  ;;  %v306_v27 = vmul.f32 0.03125, %v271_v24  ;;  %v335_v28 = vmul.f32 %v1087_v19, %v1087_v19  ;;  %v336_v25 = vmul.f32 %v1090_v20, %v1090_v20 }
 0x177   :  { %v892_v24 = vmov 0.0|0.0  }
 0x178   :  { %v1099_v29 = vsub.f32 %v1020_v31, %v305_v26  ;;  %v1102_v30 = vsub.f32 %v1030_v38, %v306_v27  ;;  %v357_v32 = vsel %vm250_vm2, %v335_v28, 0.0  ;;  %v360_v33 = vsel %vm250_vm2, %v336_v25, 0.0  ;;  %791 = vmatprep.subr.bf16.mxu1 %v892_v24 }
 0x179   :  { %v274_v34 = vpop.xlane.xlu1 %273  ;;  %358 = vadd.xlane.f32.xlu1 %v357_v32  ;;  %361 = vadd.xlane.f32.xlu0 %v360_v33  ;;  %v277_v35 = vpop.xlane.xlu0 %276  ;;  %v894_v26 = vmov 0.0   ;;  %v12_v27 = vstv %s1267_s6 }
 0x17a   :  { %v307_v36 = vmul.f32 0.03125, %v274_v34  ;;  %v308_v39 = vmul.f32 0.03125, %v277_v35  ;;  %v337_v40 = vmul.f32 %v1099_v29, %v1099_v29  ;;  %v338_v31 = vmul.f32 %v1102_v30, %v1102_v30  ;;  %788 = vmatprep.mubr.msk.f32.mxu1 %vm893_vm3, %v894_v26  ;;  %13 = vst [vmem:[#allocation2] sm:$0x1] %v12_v27 }
 0x17c   :  { %v1111_v41 = vsub.f32 %v1028_v37, %v307_v36  ;;  %v1114_v38 = vsub.f32 %v1038_v44, %v308_v39  ;;  %v363_v42 = vsel %vm250_vm2, %v337_v40, 0.0  ;;  %v366_v45 = vsel %vm250_vm2, %v338_v31, 0.0 }
 0x17d   :  { %v280_v46 = vpop.xlane.xlu1 %279  ;;  %364 = vadd.xlane.f32.xlu1 %v363_v42  ;;  %367 = vadd.xlane.f32.xlu0 %v366_v45  ;;  %v283_v47 = vpop.xlane.xlu0 %282 }
 0x17e   :  { %v309_v48 = vmul.f32 0.03125, %v280_v46  ;;  %v310_v51 = vmul.f32 0.03125, %v283_v47  ;;  %v339_v52 = vmul.f32 %v1111_v41, %v1111_v41  ;;  %v340_v37 = vmul.f32 %v1114_v38, %v1114_v38 }
 0x180   :  { %v1123_v53 = vsub.f32 %v1036_v43, %v309_v48  ;;  %v1126_v44 = vsub.f32 %v1046_v50, %v310_v51  ;;  %v369_v54 = vsel %vm250_vm2, %v339_v52, 0.0  ;;  %v372_v57 = vsel %vm250_vm2, %v340_v37, 0.0 }
 0x181   :  { %v286_v58 = vpop.xlane.xlu1 %285  ;;  %370 = vadd.xlane.f32.xlu1 %v369_v54  ;;  %373 = vadd.xlane.f32.xlu0 %v372_v57  ;;  %v289_v59 = vpop.xlane.xlu0 %288  ;;  %v523_v28 = vld [vmem:[#allocation2] sm:$0x1] }
 0x182   :  { %v311_v60 = vmul.f32 0.03125, %v286_v58  ;;  %v312_v63 = vmul.f32 0.03125, %v289_v59  ;;  %v341_v0 = vmul.f32 %v1123_v53, %v1123_v53  ;;  %v342_v43 = vmul.f32 %v1126_v44, %v1126_v44  ;;  %v1173_v59 = vld [vmem:[%s1268_s3] ss:$0 sm:$0xff] }
 0x184   :  { %v1135_v1 = vsub.f32 %v1044_v49, %v311_v60  ;;  %v1138_v50 = vsub.f32 %v1054_v56, %v312_v63  ;;  %v375_v2 = vsel %vm250_vm2, %v341_v0, 0.0  ;;  %v378_v3 = vsel %vm250_vm2, %v342_v43, 0.0 }
 0x185   :  { %v292_v5 = vpop.xlane.xlu1 %291  ;;  %376 = vadd.xlane.f32.xlu1 %v375_v2  ;;  %379 = vadd.xlane.f32.xlu0 %v378_v3  ;;  %v295_v6 = vpop.xlane.xlu0 %294 }
 0x186   :  { %v313_v7 = vmul.f32 0.03125, %v292_v5  ;;  %v314_v8 = vmul.f32 0.03125, %v295_v6  ;;  %v343_v9 = vmul.f32 %v1135_v1, %v1135_v1  ;;  %v344_v49 = vmul.f32 %v1138_v50, %v1138_v50  ;;  %v1181_v6 = vld [vmem:[%s1269_s4] ss:$0 sm:$0xff] }
 0x188   :  { %v1147_v12 = vsub.f32 %v1052_v55, %v313_v7  ;;  %v1150_v56 = vsub.f32 %v1062_v62, %v314_v8  ;;  %v381_v13 = vsel %vm250_vm2, %v343_v9, 0.0  ;;  %v384_v14 = vsel %vm250_vm2, %v344_v49, 0.0 }
 0x189   :  { %v298_v15 = vpop.xlane.xlu1 %297  ;;  %382 = vadd.xlane.f32.xlu1 %v381_v13  ;;  %385 = vadd.xlane.f32.xlu0 %v384_v14 }
 0x18a   :  { %v315_v16 = vmul.f32 0.03125, %v298_v15  ;;  %v345_v17 = vmul.f32 %v1147_v12, %v1147_v12  ;;  %v346_v18 = vmul.f32 %v1150_v56, %v1150_v56 }
 0x18c   :  { %v1159_v55 = vsub.f32 %v1060_v61, %v315_v16  ;;  %v387_v62 = vsel %vm250_vm2, %v345_v17, 0.0  ;;  %v390_v21 = vsel %vm250_vm2, %v346_v18, 0.0  ;;  %v895_v61 = vmov 0  }
 0x18d   :  { %388 = vadd.xlane.f32.xlu1 %v387_v62  ;;  %391 = vadd.xlane.f32.xlu0 %v390_v21 }
 0x18e   :  { %v347_v22 = vmul.f32 %v1159_v55, %v1159_v55  ;;  %827 = vset.pattern.permute.xlu0 %v895_v61 }
 0x190   :  { %v393_v23 = vsel %vm250_vm2, %v347_v22, 0.0 }
 0x191   :  { %394 = vadd.xlane.f32.xlu1 %v393_v23 }
 0x1a3   :  { %526 = vperm.xlu0 %827, %v523_v28  }
 0x1fe   :  { %v350_v25 = vpop.xlane.xlu0 %349 }
 0x1ff   :  { %v396_v32 = vmul.f32 0.03125, %v350_v25 }
 0x201   :  { %v412_v33 = vadd.f32 1e-05, %v396_v32 }
 0x202   :  { %v353_v34 = vpop.xlane.xlu1 %352  ;;  %v356_v35 = vpop.xlane.xlu0 %355 }
 0x203   :  { %828 = vrsqrt.f32 %v412_v33  ;;  %v397_v36 = vmul.f32 0.03125, %v353_v34  ;;  %v398_v39 = vmul.f32 0.03125, %v356_v35 }
 0x205   :  { %v413_v40 = vadd.f32 1e-05, %v397_v36  ;;  %v414_v31 = vadd.f32 1e-05, %v398_v39 }
 0x206   :  { %v359_v42 = vpop.xlane.xlu1 %358  ;;  %v362_v45 = vpop.xlane.xlu0 %361 }
 0x207   :  { %830 = vrsqrt.f32 %v413_v40  ;;  %v399_v46 = vmul.f32 0.03125, %v359_v42  ;;  %v400_v48 = vmul.f32 0.03125, %v362_v45 }
 0x208   :  { %832 = vrsqrt.f32 %v414_v31 }
 0x209   :  { %v415_v47 = vadd.f32 1e-05, %v399_v46  ;;  %v416_v54 = vadd.f32 1e-05, %v400_v48 }
 0x20a   :  { %v365_v51 = vpop.xlane.xlu1 %364  ;;  %v368_v58 = vpop.xlane.xlu0 %367 }
 0x20b   :  { %834 = vrsqrt.f32 %v415_v47  ;;  %v401_v52 = vmul.f32 0.03125, %v365_v51  ;;  %v402_v43 = vmul.f32 0.03125, %v368_v58 }
 0x20d   :  { %v829_v37 = vpop.eup %828  ;;  %v417_v57 = vadd.f32 1e-05, %v401_v52 }
 0x20e   :  { %v444_v60 = vmul.f32 %v829_v37, %v1071_v4  ;;  %v371_v63 = vpop.xlane.xlu1 %370  ;;  %v418_v4 = vadd.f32 1e-05, %v402_v43  ;;  %v374_v17 = vpop.xlane.xlu0 %373 }
 0x20f   :  { %836 = vrsqrt.f32 %v417_v57  ;;  %v403_v0 = vmul.f32 0.03125, %v371_v63  ;;  %v404_v22 = vmul.f32 0.03125, %v374_v17 }
 0x210   :  { %v467_v3 = vmul.f32 %v1173_v59, %v444_v60  ;;  %838 = vrsqrt.f32 %v416_v54 }
 0x211   :  { %v831_v2 = vpop.eup %830  ;;  %v419_v8 = vadd.f32 1e-05, %v403_v0  ;;  %v420_v28 = vadd.f32 1e-05, %v404_v22 }
 0x212   :  { %v445_v5 = vmul.f32 %v831_v2, %v1079_v11  ;;  %v833_v7 = vpop.eup %832  ;;  %v377_v49 = vpop.xlane.xlu1 %376  ;;  %v490_v14 = vadd.f32 %v1181_v6, %v467_v3 }
 0x213   :  { %v446_v15 = vmul.f32 %v833_v7, %v1076_v10  ;;  %840 = vrsqrt.f32 %v419_v8  ;;  %v405_v18 = vmul.f32 0.03125, %v377_v49  ;;  %v380_v33 = vpop.xlane.xlu0 %379 }
 0x214   :  { %v468_v9 = vmul.f32 %v1173_v59, %v445_v5  ;;  %842 = vrsqrt.f32 %v418_v4  ;;  %v406_v39 = vmul.f32 0.03125, %v380_v33 }
 0x215   :  { %v835_v13 = vpop.eup %834  ;;  %844 = vtanh.f32 %v490_v14  ;;  %v469_v23 = vmul.f32 %v1173_v59, %v446_v15  ;;  %v421_v61 = vadd.f32 1e-05, %v405_v18 }
 0x216   :  { %v447_v16 = vmul.f32 %v835_v13, %v1087_v19  ;;  %v491_v11 = vadd.f32 %v1181_v6, %v468_v9  ;;  %v383_v27 = vpop.xlane.xlu1 %382  ;;  %v422_v51 = vadd.f32 1e-05, %v406_v39 }
 0x217   :  { %v492_v25 = vadd.f32 %v1181_v6, %v469_v23  ;;  %v407_v34 = vmul.f32 0.03125, %v383_v27  ;;  %v386_v57 = vpop.xlane.xlu0 %385 }
 0x218   :  { %v470_v62 = vmul.f32 %v1173_v59, %v447_v16  ;;  %846 = vtanh.f32 %v491_v11  ;;  %v408_v63 = vmul.f32 0.03125, %v386_v57 }
 0x219   :  { %v837_v21 = vpop.eup %836  ;;  %848 = vrsqrt.f32 %v421_v61  ;;  %v423_v42 = vadd.f32 1e-05, %v407_v34 }
 0x21a   :  { %v839_v26 = vpop.eup %838  ;;  %v493_v10 = vadd.f32 %v1181_v6, %v470_v62  ;;  %v449_v19 = vmul.f32 %v837_v21, %v1099_v29  ;;  %v389_v47 = vpop.xlane.xlu1 %388  ;;  %v424_v9 = vadd.f32 1e-05, %v408_v63 }
 0x21b   :  { %v448_v32 = vmul.f32 %v839_v26, %v1090_v20  ;;  %v409_v58 = vmul.f32 0.03125, %v389_v47  ;;  %v392_v14 = vpop.xlane.xlu0 %391 }
 0x21c   :  { %850 = vtanh.f32 %v493_v10  ;;  %v472_v35 = vmul.f32 %v1173_v59, %v449_v19 }
 0x21d   :  { %v841_v36 = vpop.eup %840  ;;  %852 = vrsqrt.f32 %v420_v28  ;;  %v471_v31 = vmul.f32 %v1173_v59, %v448_v32 }
 0x21e   :  { %v843_v40 = vpop.eup %842  ;;  %854 = vtanh.f32 %v492_v25  ;;  %v495_v46 = vadd.f32 %v1181_v6, %v472_v35  ;;  %v451_v20 = vmul.f32 %v841_v36, %v1111_v41  ;;  %v395_v8 = vpop.xlane.xlu1 %394 }
 0x21f   :  { %v845_v29 = vpop.eup %844  ;;  %v494_v37 = vadd.f32 %v1181_v6, %v471_v31  ;;  %v450_v54 = vmul.f32 %v843_v40, %v1102_v30  ;;  %856 = vrsqrt.f32 %v423_v42  ;;  %v425_v30 = vadd.f32 1e-05, %v409_v58 }
 0x220   :  { %858 = vtanh.f32 %v495_v46  ;;  %v474_v41 = vmul.f32 %v1173_v59, %v451_v20  ;;  %v411_v15 = vmul.f32 0.03125, %v395_v8 }
 0x221   :  { %860 = vrsqrt.f32 %v422_v51  ;;  %v473_v43 = vmul.f32 %v1173_v59, %v450_v54 }
 0x222   :  { %v847_v45 = vpop.eup %846  ;;  %862 = vtanh.f32 %v494_v37  ;;  %v497_v5 = vadd.f32 %v1181_v6, %v474_v41 }
 0x223   :  { %v792_v52 = vpack.c.bf16 %v847_v45, %v845_v29  ;;  %v849_v60 = vpop.eup %848  ;;  %v496_v49 = vadd.f32 %v1181_v6, %v473_v43  ;;  %864 = vrsqrt.f32 %v425_v30 }
 0x224   :  { %v453_v7 = vmul.f32 %v849_v60, %v1123_v53  ;;  %866 = vtanh.f32 %v497_v5  ;;  %v410_v53 = vmul.f32 0.03125, %v392_v14  ;;  %v527_v5 = vpop.permute.xlu0 %526 }
 0x225   :  { %794 = vmatpush3.bf16.xpose.msk.msra.mxu1 %vm1200_vm4, %v792_v52  ;;  %868 = vrsqrt.f32 %v424_v9 }
 0x226   :  { %795 = vmatprep.subr.bf16.mxu1 %v892_v24  ;;  %v851_v0 = vpop.eup %850  ;;  %v476_v16 = vmul.f32 %v1173_v59, %v453_v7  ;;  %870 = vtanh.f32 %v496_v49  ;;  %v426_v26 = vadd.f32 1e-05, %v410_v53 }
 0x227   :  { %v853_v2 = vpop.eup %852 }
 0x228   :  { %v855_v3 = vpop.eup %854  ;;  %v452_v13 = vmul.f32 %v853_v2, %v1114_v38  ;;  %v427_v38 = vadd.f32 1e-05, %v411_v15  ;;  %v499_v22 = vadd.f32 %v1181_v6, %v476_v16  ;;  %v529_v2 = vlaneseq }
 0x229   :  { %v796_v4 = vpack.c.bf16 %v851_v0, %v855_v3  ;;  %v857_v17 = vpop.eup %856 }
 0x22a   :  { %v859_v11 = vpop.eup %858  ;;  %v475_v18 = vmul.f32 %v1173_v59, %v452_v13  ;;  %v455_v23 = vmul.f32 %v857_v17, %v1135_v1  ;;  %872 = vrsqrt.f32 %v427_v38  ;;  %v530_v30 = vshrl.u32 %v529_v2, 7 }
 0x22b   :  { %v861_v62 = vpop.eup %860  ;;  %874 = vtanh.f32 %v499_v22 }
 0x22c   :  { %v863_v21 = vpop.eup %862  ;;  %v498_v10 = vadd.f32 %v1181_v6, %v475_v18  ;;  %v454_v19 = vmul.f32 %v861_v62, %v1126_v44  ;;  %v478_v27 = vmul.f32 %v1173_v59, %v455_v23  ;;  %876 = vrsqrt.f32 %v426_v26 }
 0x22d   :  { %798 = vmatpush3.bf16.xpose.msk.msra.mxu1 %vm1200_vm4, %v796_v4  ;;  %v800_v61 = vpack.c.bf16 %v859_v11, %v863_v21  ;;  %v865_v28 = vpop.eup %864  ;;  %v531_v3 = vsub.s32 0, %v530_v30 }
 0x22e   :  { %799 = vmatprep.subr.bf16.mxu1 %v892_v24  ;;  %v867_v25 = vpop.eup %866  ;;  %878 = vtanh.f32 %v498_v10  ;;  %v477_v1 = vmul.f32 %v1173_v59, %v454_v19  ;;  %v501_v34 = vadd.f32 %v1181_v6, %v478_v27  ;;  %v457_v44 = vmul.f32 %v865_v28, %v1147_v12 }
 0x22f   :  { %v869_v32 = vpop.eup %868  ;;  %v532_v7 = vrot.slane %v527_v5, %v531_v3 }
 0x230   :  { %v871_v33 = vpop.eup %870  ;;  %v500_v36 = vadd.f32 %v1181_v6, %v477_v1  ;;  %v456_v39 = vmul.f32 %v869_v32, %v1138_v50  ;;  %880 = vtanh.f32 %v501_v34  ;;  %v480_v40 = vmul.f32 %v1173_v59, %v457_v44 }
 0x231   :  { %v804_v35 = vpack.c.bf16 %v867_v25, %v871_v33 }
 0x232   :  { %882 = vtanh.f32 %v500_v36  ;;  %v479_v42 = vmul.f32 %v1173_v59, %v456_v39  ;;  %v503_v46 = vadd.f32 %v1181_v6, %v480_v40 }
 0x234   :  { %v873_v31 = vpop.eup %872  ;;  %v502_v47 = vadd.f32 %v1181_v6, %v479_v42  ;;  %884 = vtanh.f32 %v503_v46 }
 0x235   :  { %802 = vmatpush3.bf16.xpose.msk.msra.mxu1 %vm1200_vm4, %v800_v61  ;;  %v875_v29 = vpop.eup %874  ;;  %v459_v20 = vmul.f32 %v873_v31, %v1159_v55 }
 0x236   :  { %803 = vmatprep.subr.bf16.mxu1 %v892_v24  ;;  %v877_v45 = vpop.eup %876  ;;  %886 = vtanh.f32 %v502_v47 }
 0x237   :  { %v458_v51 = vmul.f32 %v877_v45, %v1150_v56  ;;  %v482_v52 = vmul.f32 %v1173_v59, %v459_v20 }
 0x238   :  { %v879_v12 = vpop.eup %878 }
 0x239   :  { %v808_v50 = vpack.c.bf16 %v875_v29, %v879_v12  ;;  %v481_v54 = vmul.f32 %v1173_v59, %v458_v51  ;;  %v505_v55 = vadd.f32 %v1181_v6, %v482_v52 }
 0x23a   :  { %v881_v37 = vpop.eup %880 }
 0x23b   :  { %v504_v41 = vadd.f32 %v1181_v6, %v481_v54  ;;  %888 = vtanh.f32 %v505_v55  ;;  %v522_v6 = vld [vmem:[%s1270_s5] sm:$0x1] }
 0x23c   :  { %v883_v57 = vpop.eup %882 }
 0x23d   :  { %806 = vmatpush3.bf16.xpose.msk.msra.mxu1 %vm1200_vm4, %v804_v35  ;;  %v812_v58 = vpack.c.bf16 %v881_v37, %v883_v57  ;;  %890 = vtanh.f32 %v504_v41 }
 0x23e   :  { %807 = vmatprep.subr.bf16.mxu1 %v892_v24  ;;  %v885_v56 = vpop.eup %884 }
 0x240   :  { %v887_v60 = vpop.eup %886 }
 0x241   :  { %v816_v63 = vpack.c.bf16 %v885_v56, %v887_v60 }
 0x245   :  { %810 = vmatpush3.bf16.xpose.msk.msra.mxu1 %vm1200_vm4, %v808_v50  ;;  %v889_v59 = vpop.eup %888 }
 0x246   :  { %811 = vmatprep.subr.bf16.mxu1 %v892_v24 }
 0x247   :  { %v891_v0 = vpop.eup %890 }
 0x248   :  { %v820_v43 = vpack.c.bf16 %v889_v59, %v891_v0 }
 0x24d   :  { %814 = vmatpush3.bf16.xpose.msk.msra.mxu1 %vm1200_vm4, %v812_v58 }
 0x24e   :  { %815 = vmatprep.subr.bf16.mxu1 %v892_v24 }
 0x255   :  { %818 = vmatpush3.bf16.xpose.msk.msra.mxu1 %vm1200_vm4, %v816_v63 }
 0x256   :  { %819 = vmatprep.subr.bf16.mxu1 %v892_v24 }
 0x25d   :  { %822 = vmatpush3.bf16.xpose.msk.msra.mxu1 %vm1200_vm4, %v820_v43 }
 0x264   :  { %789 = vmatmul.mubr.msk.f32.vlgmr.msra.gmra.mrb[0].mxu1 %vm250_vm2, %v522_v6 }
 0x337   :  { %v650_v8 = vpop.f32.mrb[0].mxu1 }
 0x338   :  { %v651_v9 = vadd.f32 %v650_v8, %v532_v7  ;;  %v790_v24 = vpop.f32.mrb[1].mxu1 }
 0x33a   :  { %654 = vst [vmem:[%s1271_s7] sm:$0x1] %v651_v9 }

</bundles_post_ra>
